<compile_context>
chip_gen: v7x
topology: tpu7x:2x2x1
jax: 0.10.0
libtpu: 0.0.40
codegen_flags: <defaults>
</compile_context>

<pallas_src>
import jax
import jax.numpy as jnp
from jax.experimental import pallas as pl
from jax.experimental.pallas import tpu as pltpu


def _round_up(v, m):
    return -(-v // m) * m


def _conv1x1_kernel(x_ref, w_ref, b_ref, o_ref):
    # x_ref: (Bb, C_in, tile)   activation block (spatial on lanes)
    # w_ref: (C_out, C_in)      full 1x1-conv weight (constant across grid)
    # b_ref: (C_out, 1)         bias column (broadcasts over lanes)
    # o_ref: (Bb, C_out, tile)  lane-dense output block
    w = w_ref[...]
    b = b_ref[...]
    for bb in range(x_ref.shape[0]):          # Bb is small & static -> unrolled
        acc = jnp.dot(w, x_ref[bb], preferred_element_type=jnp.float32)
        o_ref[bb] = (acc + b).astype(o_ref.dtype)


def _pick_launch(B, C_in, C_out, HW, bpe, max_tile_hw=None):
    """Choose (tile_hw, batch_block, vmem_limit_bytes) from a per-chip VMEM budget."""
    LANE = 128
    sub = max(8, 32 // max(bpe, 1))           # sublanes per vreg for this dtype
    c_in_p = _round_up(C_in, sub)
    c_out_p = _round_up(C_out, sub)

    try:
        kind = jax.devices()[0].device_kind.lower()
    except Exception:
        kind = ""
    if ("v5" in kind) or ("v6" in kind):      # 128 MiB VMEM per core
        budget, vmem_limit = 48 << 20, 80 << 20
    else:                                     # v7x (64 MiB / TC) or unknown: conservative
        budget, vmem_limit = 26 << 20, 42 << 20

    # Constant operands (counted double-buffered, worst case) incl. layout padding.
    w_bytes = 4 * _round_up(C_out, 8) * _round_up(C_in, LANE)
    b_bytes = 4 * _round_up(C_out, 8) * LANE
    avail = max(budget - 2 * (w_bytes + b_bytes), 2 << 20)

    # Double-buffered activation in + out, per lane column, per batch image.
    per_lane = 2 * bpe * (c_in_p + c_out_p)

    tile = (avail // per_lane) // LANE * LANE
    tile = max(tile, LANE)
    tile = min(tile, _round_up(HW, LANE))
    if max_tile_hw is not None:
        tile = min(tile, max(LANE, (max_tile_hw // LANE) * LANE))
    # B == 1: keep >= 2 spatial blocks so both v7x TensorCores get work.
    if B == 1 and tile >= HW and HW > LANE:
        tile = max(LANE, ((HW // 2) // LANE) * LANE)
    if tile >= HW:
        tile = HW                             # full extent: always a legal block dim
    n_hw = -(-HW // tile)

    # Fold several batch images into one step when a single image is tiny.
    bb = 1
    if n_hw == 1 and B > 1:
        step_payload = bpe * (c_in_p + c_out_p) * tile
        target = 512 << 10
        if step_payload < target:
            bb = min(B, -(-target // step_payload))
            bb = min(bb, max(1, avail // (per_lane * tile)))   # stay inside VMEM budget
            bb = min(bb, max(1, B // 2))                       # keep >= 2 steps (megacore)
    return tile, bb, vmem_limit


def detection_head_forward(x, weight, bias, num_anchors, num_classes,
                           max_tile_hw=None):
    """x: [B, C_in, H, W]; weight: [C_out, C_in] (1x1 conv kernel squeezed);
       bias: [C_out].  Returns [B, num_anchors, 5 + num_classes, H, W]."""
    B, C_in, H, W = x.shape
    C_out = num_anchors * (5 + num_classes)
    assert weight.shape == (C_out, C_in)
    assert bias.shape == (C_out,)

    HW = H * W
    bpe = x.dtype.itemsize
    tile, Bb, vmem_limit = _pick_launch(B, C_in, C_out, HW, bpe, max_tile_hw)
    n_b = -(-B // Bb)
    n_hw = -(-HW // tile)

    # NCHW -> (B, C_in, HW): pure reshape, no transpose, no padding copy.
    x_flat = x.reshape(B, C_in, HW)
    w = weight.astype(x.dtype)
    b_col = bias.reshape(C_out, 1).astype(jnp.float32)

    flops = 2 * B * HW * C_in * C_out
    bytes_accessed = (bpe * B * HW * (C_in + C_out)
                      + w.dtype.itemsize * C_out * C_in + 4 * C_out)

    def build(single_buffer_consts):
        const_kw = ({"pipeline_mode": pl.Buffered(buffer_count=1)}
                    if single_buffer_consts else {})
        return pl.pallas_call(
            _conv1x1_kernel,
            out_shape=jax.ShapeDtypeStruct((B, C_out, HW), x.dtype),
            grid_spec=pltpu.PrefetchScalarGridSpec(
                num_scalar_prefetch=0,
                grid=(n_b, n_hw),
                in_specs=[
                    pl.BlockSpec((Bb, C_in, tile), lambda bi, j: (bi, 0, j)),
                    pl.BlockSpec((C_out, C_in), lambda bi, j: (0, 0), **const_kw),
                    pl.BlockSpec((C_out, 1), lambda bi, j: (0, 0), **const_kw),
                ],
                out_specs=pl.BlockSpec((Bb, C_out, tile),
                                       lambda bi, j: (bi, 0, j)),
            ),
            compiler_params=pltpu.CompilerParams(
                dimension_semantics=("parallel", "parallel"),
                vmem_limit_bytes=int(vmem_limit),
            ),
            cost_estimate=pl.CostEstimate(
                flops=flops, transcendentals=0, bytes_accessed=bytes_accessed),
        )

    try:
        out_flat = build(True)(x_flat, w, b_col)
    except Exception:
        # Pallas builds that reject single-buffered constants: default buffering.
        out_flat = build(False)(x_flat, w, b_col)

    # (B, C_out, HW) -> (B, A, 5+nc, H, W): free row-major reshape, identical to
    # the PyTorch .view() of the NCHW conv output.
    return out_flat.reshape(B, num_anchors, 5 + num_classes, H, W)


def _reference(x, weight, bias, num_anchors, num_classes):
    B, _, H, W = x.shape
    ref = jnp.einsum("bchw,oc->bohw", x, weight) + bias[None, :, None, None]
    return ref.reshape(B, num_anchors, 5 + num_classes, H, W)


if __name__ == "__main__":
    key = jax.random.PRNGKey(0)

    def make_case(k, B, C_in, H, W, num_classes, num_anchors):
        kx, kw, kb = jax.random.split(k, 3)
        C_out = num_anchors * (5 + num_classes)
        x = jax.random.normal(kx, (B, C_in, H, W), dtype=jnp.float32)
        weight = jax.random.normal(kw, (C_out, C_in), dtype=jnp.float32) * 0.1
        bias = jax.random.normal(kb, (C_out,), dtype=jnp.float32) * 0.1
        return x, weight, bias

    k1, k2, k3 = jax.random.split(key, 3)

    # Case 1: module's nominal small shapes.
    x, w, b = make_case(k1, 2, 4, 16, 16, 1, 1)
    out = jax.block_until_ready(detection_head_forward(x, w, b, 1, 1))
    assert out.shape == (2, 1, 6, 16, 16)
    assert jnp.allclose(out, _reference(x, w, b, 1, 1), atol=1e-5, rtol=1e-5)

    # Case 2: many tiny images -> exercises batch-block fattening (Bb > 1).
    x, w, b = make_case(k2, 8, 4, 8, 8, 1, 1)
    out = jax.block_until_ready(detection_head_forward(x, w, b, 1, 1))
    assert jnp.allclose(out, _reference(x, w, b, 1, 1), atol=1e-5, rtol=1e-5)

    # Case 3: HW not a multiple of the tile -> exercises the masked partial edge
    # block (no host-side pad / slice anywhere in the path).
    x, w, b = make_case(k3, 2, 4, 20, 20, 1, 1)
    out = jax.block_until_ready(
        detection_head_forward(x, w, b, 1, 1, max_tile_hw=128))
    assert jnp.allclose(out, _reference(x, w, b, 1, 1), atol=1e-5, rtol=1e-5)

    print("KERNEL_OK")
</pallas_src>

<mosaic_0001>
module attributes {stable_mosaic.version = 11 : i64} {
  func.func @_conv1x1_kernel(%arg0: i32, %arg1: i32, %arg2: memref<1x4x256xf32, #tpu.memory_space<vmem>>, %arg3: memref<6x4xf32, #tpu.memory_space<vmem>>, %arg4: memref<6x1xf32, #tpu.memory_space<vmem>>, %arg5: memref<1x6x256xf32, #tpu.memory_space<vmem>>) attributes {dimension_semantics = [#tpu.dimension_semantics<parallel>, #tpu.dimension_semantics<parallel>], iteration_bounds = array<i64: 2, 1>, scalar_prefetch = 0 : i64, scratch_operands = 0 : i64, tpu.core_type = #tpu.core_type<tc>, window_params = [{transform_indices = @transform_0, window_bounds = array<i64: 1, 4, 256>}, {pipeline_mode = #tpu.pipeline_mode<synchronous>, transform_indices = @transform_1, window_bounds = array<i64: 6, 4>}, {pipeline_mode = #tpu.pipeline_mode<synchronous>, transform_indices = @transform_2, window_bounds = array<i64: 6, 1>}, {transform_indices = @transform_3, window_bounds = array<i64: 1, 6, 256>}]} {
    %c0 = arith.constant 0 : index
    %c0_0 = arith.constant 0 : index
    %0 = vector.load %arg3[%c0, %c0_0] : memref<6x4xf32, #tpu.memory_space<vmem>>, vector<6x4xf32>
    %c0_1 = arith.constant 0 : index
    %c0_2 = arith.constant 0 : index
    %1 = vector.load %arg4[%c0_1, %c0_2] : memref<6x1xf32, #tpu.memory_space<vmem>>, vector<6x1xf32>
    %c0_3 = arith.constant 0 : index
    %c0_4 = arith.constant 0 : index
    %c0_5 = arith.constant 0 : index
    %2 = vector.load %arg2[%c0_3, %c0_4, %c0_5] : memref<1x4x256xf32, #tpu.memory_space<vmem>>, vector<1x4x256xf32>
    %3 = vector.shape_cast %2 : vector<1x4x256xf32> to vector<4x256xf32>
    %cst = arith.constant dense<0.000000e+00> : vector<6x256xf32>
    %4 = tpu.matmul %0, %3, %cst {dimension_numbers = #tpu.dot_dimension_numbers<[1], [0], [0], [1], [0, 0, 1, 1], [], []>} : vector<6x4xf32>, vector<4x256xf32>, vector<6x256xf32> -> vector<6x256xf32>
    %5 = vector.broadcast %1 : vector<6x1xf32> to vector<6x256xf32>
    %6 = arith.addf %4, %5 : vector<6x256xf32>
    %c0_6 = arith.constant 0 : index
    %c0_7 = arith.constant 0 : index
    %c0_8 = arith.constant 0 : index
    %7 = vector.load %arg5[%c0_6, %c0_7, %c0_8] : memref<1x6x256xf32, #tpu.memory_space<vmem>>, vector<1x6x256xf32>
    %8 = vector.shape_cast %7 : vector<1x6x256xf32> to vector<6x256xf32>
    %9 = vector.shape_cast %6 : vector<6x256xf32> to vector<1x6x256xf32>
    tpu.vector_store %arg5[%c0_6, %c0_7, %c0_8], %9 {strides = array<i32>} : memref<1x6x256xf32, #tpu.memory_space<vmem>>, vector<1x6x256xf32>,
    return
  }
  func.func @transform_0(%arg0: i32, %arg1: i32) -> (i32, i32, i32) {
    %c0_i32 = arith.constant 0 : i32
    %c0_i32_0 = arith.constant 0 : i32
    return %arg0, %c0_i32, %arg1 : i32, i32, i32
  }
  func.func @transform_1(%arg0: i32, %arg1: i32) -> (i32, i32) {
    %c0_i32 = arith.constant 0 : i32
    %c0_i32_0 = arith.constant 0 : i32
    %c0_i32_1 = arith.constant 0 : i32
    return %c0_i32, %c0_i32_0 : i32, i32
  }
  func.func @transform_2(%arg0: i32, %arg1: i32) -> (i32, i32) {
    %c0_i32 = arith.constant 0 : i32
    %c0_i32_0 = arith.constant 0 : i32
    %c0_i32_1 = arith.constant 0 : i32
    return %c0_i32, %c0_i32_0 : i32, i32
  }
  func.func @transform_3(%arg0: i32, %arg1: i32) -> (i32, i32, i32) {
    %c0_i32 = arith.constant 0 : i32
    %c0_i32_0 = arith.constant 0 : i32
    return %arg0, %c0_i32, %arg1 : i32, i32, i32
  }
}

module attributes {stable_mosaic.version = 11 : i64} {
  func.func @_conv1x1_kernel(%arg0: i32, %arg1: i32, %arg2: memref<1x4x256xf32, #tpu.memory_space<vmem>>, %arg3: memref<6x4xf32, #tpu.memory_space<vmem>>, %arg4: memref<6x1xf32, #tpu.memory_space<vmem>>, %arg5: memref<1x6x256xf32, #tpu.memory_space<vmem>>) attributes {dimension_semantics = [#tpu.dimension_semantics<parallel>, #tpu.dimension_semantics<parallel>], iteration_bounds = array<i64: 2, 1>, scalar_prefetch = 0 : i64, scratch_operands = 0 : i64, tpu.core_type = #tpu.core_type<tc>, window_params = [{transform_indices = @transform_0, window_bounds = array<i64: 1, 4, 256>}, {pipeline_mode = #tpu.pipeline_mode<synchronous>, transform_indices = @transform_1, window_bounds = array<i64: 6, 4>}, {pipeline_mode = #tpu.pipeline_mode<synchronous>, transform_indices = @transform_2, window_bounds = array<i64: 6, 1>}, {transform_indices = @transform_3, window_bounds = array<i64: 1, 6, 256>}]} {
    %c0 = arith.constant 0 : index
    %c0_0 = arith.constant 0 : index
    %0 = vector.load %arg3[%c0, %c0_0] : memref<6x4xf32, #tpu.memory_space<vmem>>, vector<6x4xf32>
    %c0_1 = arith.constant 0 : index
    %c0_2 = arith.constant 0 : index
    %1 = vector.load %arg4[%c0_1, %c0_2] : memref<6x1xf32, #tpu.memory_space<vmem>>, vector<6x1xf32>
    %c0_3 = arith.constant 0 : index
    %c0_4 = arith.constant 0 : index
    %c0_5 = arith.constant 0 : index
    %2 = vector.load %arg2[%c0_3, %c0_4, %c0_5] : memref<1x4x256xf32, #tpu.memory_space<vmem>>, vector<1x4x256xf32>
    %3 = vector.shape_cast %2 : vector<1x4x256xf32> to vector<4x256xf32>
    %cst = arith.constant dense<0.000000e+00> : vector<6x256xf32>
    %4 = tpu.matmul %0, %3, %cst {dimension_numbers = #tpu.dot_dimension_numbers<[1], [0], [0], [1], [0, 0, 1, 1], [], []>} : vector<6x4xf32>, vector<4x256xf32>, vector<6x256xf32> -> vector<6x256xf32>
    %5 = vector.broadcast %1 : vector<6x1xf32> to vector<6x256xf32>
    %6 = arith.addf %4, %5 : vector<6x256xf32>
    %c0_6 = arith.constant 0 : index
    %c0_7 = arith.constant 0 : index
    %c0_8 = arith.constant 0 : index
    %7 = vector.load %arg5[%c0_6, %c0_7, %c0_8] : memref<1x6x256xf32, #tpu.memory_space<vmem>>, vector<1x6x256xf32>
    %8 = vector.shape_cast %7 : vector<1x6x256xf32> to vector<6x256xf32>
    %9 = vector.shape_cast %6 : vector<6x256xf32> to vector<1x6x256xf32>
    tpu.vector_store %arg5[%c0_6, %c0_7, %c0_8], %9 {strides = array<i32>} : memref<1x6x256xf32, #tpu.memory_space<vmem>>, vector<1x6x256xf32>,
    return
  }
  func.func @transform_0(%arg0: i32, %arg1: i32) -> (i32, i32, i32) {
    %c0_i32 = arith.constant 0 : i32
    %c0_i32_0 = arith.constant 0 : i32
    return %arg0, %c0_i32, %arg1 : i32, i32, i32
  }
  func.func @transform_1(%arg0: i32, %arg1: i32) -> (i32, i32) {
    %c0_i32 = arith.constant 0 : i32
    %c0_i32_0 = arith.constant 0 : i32
    %c0_i32_1 = arith.constant 0 : i32
    return %c0_i32, %c0_i32_0 : i32, i32
  }
  func.func @transform_2(%arg0: i32, %arg1: i32) -> (i32, i32) {
    %c0_i32 = arith.constant 0 : i32
    %c0_i32_0 = arith.constant 0 : i32
    %c0_i32_1 = arith.constant 0 : i32
    return %c0_i32, %c0_i32_0 : i32, i32
  }
  func.func @transform_3(%arg0: i32, %arg1: i32) -> (i32, i32, i32) {
    %c0_i32 = arith.constant 0 : i32
    %c0_i32_0 = arith.constant 0 : i32
    return %arg0, %c0_i32, %arg1 : i32, i32, i32
  }
}

</mosaic_0001>

<bundles_post_ra>
// kernel: tpu_custom_call.1
= control target key start
LH: loop header
LB: loop body
LE: loop exit
PB: predicated region body
PF: predicated region fallthrough
CT: control target
= control target key end

     0   :  { %s479_s12 = smov 0   ;;  %s481_s13 = smov 0   ;;  %s518_s0 = inlined_call_operand.vmem [shape: f32[2,4,256], index: 0, kind: input, shape index: {}]   ;;  %s519_s1 = inlined_call_operand.vmem [shape: f32[6,4], index: 1, kind: input, shape index: {}]   ;;  %s520_s2 = inlined_call_operand.vmem [shape: f32[6,1], index: 2, kind: input, shape index: {}]   ;;  %s521_s3 = inlined_call_operand.vmem [shape: f32[2,6,256], index: 3, kind: output, shape index: {}]  }
   0x1   :  { %s483_s14 = smov 0  }
   0x2 LB: > { %s25_s15 = sadd.s32 1, %s451_s13  ;;  %p393_p0 = scmp.ge.s32.totalorder %s455_s14, 1  ;;  %s455_s14 = sphi %s483_s14, %s13_s14   ;;  %s451_s13 = sphi %s481_s13, %s523_s13   ;;  %s447_s12 = sphi %s479_s12, %s522_s12  }
   0x3   : > { %p27_p1 = scmp.ge.s32.totalorder %s25_s15, 2  ;;  %p158_p2 = scmp.lt.s32.totalorder %s455_s14, 3 }
   0x5   : > { %s525_s15 = smov (%p27_p1, %s25_s15), 0  ;;  %p159_p3 = pnand %p393_p0, %p158_p2 }
   0x6   : > { %p191_p4 = scmp.lt.s32.totalorder (!%p159_p3), %s447_s12, 1  ;;  %v457_v0 = vmov (!%p159_p3), 0.0   ;;  %v211_v1 = vld [vmem:[%s520_s2] sm:$0x3f] (!%p159_p3)  ;;  %v458_v2 = vmov (!%p159_p3), 0   ;;  %vm224_vm0 = vcmask (!%p159_p3), 1043456  }
   0x7   : > { %162 = sbr.rel (%p159_p3) target bundleno = 238 (0xee), region = 32  ;;  %293 = vmatprep.mubr.f32.mxu0 (!%p159_p3), %v457_v0  ;;  %431 = vset.pattern.permute.xlu0 (!%p159_p3), %v458_v2  ;;  %v210_v5 = vld [vmem:[%s519_s1] sm:$0x3f] (!%p159_p3)  ;;  %vm220_vm1 = vcmask (!%p159_p3), 31744  }
   0x8   : > { %215 = vperm.xlu0 (!%p159_p3), %431, %v211_v1  }
   0xe   : > { %s527_s12 = smov (!%p191_p4, %s447_s12), 1 }
   0xf   : > { %s403_s18 = sshll.u32 %s527_s12, 3  ;;  %s404_s24 = sshll.u32 %s527_s12, 4 }
  0x10   : > { %s198_s21 = scalar_lea.vmem %s518_s0, %s403_s18  ;;  %s208_s27 = scalar_lea.vmem %s521_s3, %s404_s24 }
  0x11   : > { %v212_v3 = vld [vmem:[%s198_s21] sm:$0xff] }
  0x12   : > { %v219_v4 = vcombine.high %v212_v3, %v212_v3 }
  0x14   : > { %398 = vmatprep.subr.msk.mxu0 %vm224_vm0, %v219_v4 }
  0x15   : > { %399 = vmatpush1.msk.msra.mxu0 %vm224_vm0, %v212_v3 }
  0x16   : > { %400 = vmatmul.mubr.msk.f32.vlgmr.msra.gmra.mrb[0].mxu0 %vm220_vm1, %v210_v5 }
  0x87   : > { %v216_v6 = vpop.permute.xlu0 %215 }
  0xe9   : > { %v295_v7 = vpop.f32.mrb[0].mxu0 }
  0xea   : > { %v296_v8 = vadd.f32 %v295_v7, %v216_v6  ;;  %v297_v9 = vpop.f32.mrb[1].mxu0 }
  0xeb   : > { %v298_v10 = vadd.f32 %v297_v9, %v216_v6 }
  0xec   : > { %300 = vst [vmem:[%s208_s27] sm:$0x3f] %v296_v8 }
  0xed   : > { %301 = vst [vmem:[%s208_s27 + $0x8] sm:$0x3f] %v298_v10 }
  0xee PF: > { %s13_s14 = sadd.s32 1, %s455_s14   ;;  %s522_s12 = smov %s451_s13 }
  0xef   : > { %p10_p5 = scmp.ge.s32.totalorder %s13_s14, 4   ;;  %s523_s13 = smov %s525_s15 }
  0xf1   :  { %12 = sbr.rel (!%p10_p5) target bundleno = 2 (0x2), region = 62 }

// kernel: tpu_custom_call.1
= control target key start
LH: loop header
LB: loop body
LE: loop exit
PB: predicated region body
PF: predicated region fallthrough
CT: control target
= control target key end

     0   :  { %s479_s12 = smov 0   ;;  %s481_s13 = smov 0   ;;  %s518_s0 = inlined_call_operand.vmem [shape: f32[2,4,256], index: 0, kind: input, shape index: {}]   ;;  %s519_s1 = inlined_call_operand.vmem [shape: f32[6,4], index: 1, kind: input, shape index: {}]   ;;  %s520_s2 = inlined_call_operand.vmem [shape: f32[6,1], index: 2, kind: input, shape index: {}]   ;;  %s521_s3 = inlined_call_operand.vmem [shape: f32[2,6,256], index: 3, kind: output, shape index: {}]  }
   0x1   :  { %s483_s14 = smov 0  }
   0x2 LB: > { %s25_s15 = sadd.s32 1, %s451_s13  ;;  %p393_p0 = scmp.ge.s32.totalorder %s455_s14, 1  ;;  %s455_s14 = sphi %s483_s14, %s13_s14   ;;  %s451_s13 = sphi %s481_s13, %s523_s13   ;;  %s447_s12 = sphi %s479_s12, %s522_s12  }
   0x3   : > { %p27_p1 = scmp.ge.s32.totalorder %s25_s15, 2  ;;  %p158_p2 = scmp.lt.s32.totalorder %s455_s14, 3 }
   0x5   : > { %s525_s15 = smov (%p27_p1, %s25_s15), 0  ;;  %p159_p3 = pnand %p393_p0, %p158_p2 }
   0x6   : > { %p191_p4 = scmp.lt.s32.totalorder (!%p159_p3), %s447_s12, 1  ;;  %v457_v0 = vmov (!%p159_p3), 0.0   ;;  %v211_v1 = vld [vmem:[%s520_s2] sm:$0x3f] (!%p159_p3)  ;;  %v458_v2 = vmov (!%p159_p3), 0   ;;  %vm224_vm0 = vcmask (!%p159_p3), 1043456  }
   0x7   : > { %162 = sbr.rel (%p159_p3) target bundleno = 238 (0xee), region = 32  ;;  %293 = vmatprep.mubr.f32.mxu0 (!%p159_p3), %v457_v0  ;;  %431 = vset.pattern.permute.xlu0 (!%p159_p3), %v458_v2  ;;  %v210_v5 = vld [vmem:[%s519_s1] sm:$0x3f] (!%p159_p3)  ;;  %vm220_vm1 = vcmask (!%p159_p3), 31744  }
   0x8   : > { %215 = vperm.xlu0 (!%p159_p3), %431, %v211_v1  }
   0xe   : > { %s527_s12 = smov (!%p191_p4, %s447_s12), 1 }
   0xf   : > { %s403_s18 = sshll.u32 %s527_s12, 3  ;;  %s404_s24 = sshll.u32 %s527_s12, 4 }
  0x10   : > { %s198_s21 = scalar_lea.vmem %s518_s0, %s403_s18  ;;  %s208_s27 = scalar_lea.vmem %s521_s3, %s404_s24 }
  0x11   : > { %v212_v3 = vld [vmem:[%s198_s21] sm:$0xff] }
  0x12   : > { %v219_v4 = vcombine.high %v212_v3, %v212_v3 }
  0x14   : > { %398 = vmatprep.subr.msk.mxu0 %vm224_vm0, %v219_v4 }
  0x15   : > { %399 = vmatpush1.msk.msra.mxu0 %vm224_vm0, %v212_v3 }
  0x16   : > { %400 = vmatmul.mubr.msk.f32.vlgmr.msra.gmra.mrb[0].mxu0 %vm220_vm1, %v210_v5 }
  0x87   : > { %v216_v6 = vpop.permute.xlu0 %215 }
  0xe9   : > { %v295_v7 = vpop.f32.mrb[0].mxu0 }
  0xea   : > { %v296_v8 = vadd.f32 %v295_v7, %v216_v6  ;;  %v297_v9 = vpop.f32.mrb[1].mxu0 }
  0xeb   : > { %v298_v10 = vadd.f32 %v297_v9, %v216_v6 }
  0xec   : > { %300 = vst [vmem:[%s208_s27] sm:$0x3f] %v296_v8 }
  0xed   : > { %301 = vst [vmem:[%s208_s27 + $0x8] sm:$0x3f] %v298_v10 }
  0xee PF: > { %s13_s14 = sadd.s32 1, %s455_s14   ;;  %s522_s12 = smov %s451_s13 }
  0xef   : > { %p10_p5 = scmp.ge.s32.totalorder %s13_s14, 4   ;;  %s523_s13 = smov %s525_s15 }
  0xf1   :  { %12 = sbr.rel (!%p10_p5) target bundleno = 2 (0x2), region = 62 }

</bundles_post_ra>
